<compile_context>
chip_gen: v5e
topology: v5e:2x2
jax: 0.10.0
libtpu: 0.0.40
codegen_flags: <defaults>
</compile_context>

<pallas_src>
import math

import jax
import jax.numpy as jnp
from jax.experimental import pallas as pl
from jax.experimental.pallas import tpu as pltpu

# Problem sizes (match the PyTorch module + a small test input).
N = 2
CIN = 3
COUT = 3
K = 3
H = W = 16
STRIDE = 2
PAD = 1
DIL = 2

# Output spatial size: floor((H + 2*PAD - DIL*(K-1) - 1)/STRIDE + 1)
HOUT = (H + 2 * PAD - DIL * (K - 1) - 1) // STRIDE + 1   # 7
WOUT = (W + 2 * PAD - DIL * (K - 1) - 1) // STRIDE + 1   # 7
# Even-strided padded input spatial size.
HS = HOUT + K - 1                                        # 9
WS = WOUT + K - 1                                        # 9

KDIM = CIN * K * K            # 27  (conv reduction dim)
KDIM_B = KDIM + 1             # 28  (+1 row of ones carries the bias)
PIX = N * HOUT * WOUT         # 98  (flattened output-pixel dim)

# Padded, lane/sublane-aligned shapes seen by the kernel.
ROW_PAD = 8                   # COUT padded to sublane count
KDIM_PAD = 32                 # reduction dim padded
PIX_PAD = 128                 # output pixels padded to one full lane width


def conv_relu_kernel(w_ref, p_ref, o_ref):
    """Single-invocation im2col conv (+bias folded into the matmul) + ReLU.

    w_ref: VMEM (ROW_PAD, KDIM_PAD)  padded (COUT, CIN*K*K + 1) weight|bias matrix
    p_ref: VMEM (KDIM_PAD, PIX_PAD)  padded (CIN*K*K + 1, N*HOUT*WOUT) patches|ones
    o_ref: VMEM (ROW_PAD, PIX_PAD)   lane-dense output block (unmasked stores)
    """
    acc = jnp.dot(w_ref[...], p_ref[...], preferred_element_type=jnp.float32)
    o_ref[...] = jnp.maximum(acc, 0.0)


@jax.jit
def conv_relu(x, weight, bias):
    """x: (N, CIN, H, W) f32, weight: (COUT, CIN, K, K) f32, bias: (COUT,) f32."""
    assert STRIDE == 2 and DIL == 2 and PAD == 1, "even-index trick assumes these hyperparams"
    assert PIX <= PIX_PAD, "design assumes N*HOUT*WOUT <= 128 (single lane-dense block)"
    assert COUT <= ROW_PAD and KDIM_B <= KDIM_PAD, "design assumes COUT <= 8, CIN*K*K+1 <= 32"

    x = x.astype(jnp.float32)
    # Zero-pad then take the even-strided view (the only pixels the conv ever reads).
    x_pad = jnp.pad(x, ((0, 0), (0, 0), (PAD, PAD), (PAD, PAD)))
    x_even = x_pad[:, :, ::STRIDE, ::STRIDE]                    # (N, CIN, HS, WS)

    # im2col in the (jitted) wrapper so the kernel's vector axis is the flattened
    # output-pixel axis (lane-dense):
    #   patches[ci, kh, kw, n, oh, ow] = x_even[n, ci, kh+oh, kw+ow]
    rows = []
    for kh in range(K):
        row = [x_even[:, :, kh:kh + HOUT, kw:kw + WOUT] for kw in range(K)]
        rows.append(jnp.stack(row, axis=2))          # (N, CIN, K_w, HOUT, WOUT)
    patches = jnp.stack(rows, axis=2)                # (N, CIN, K_h, K_w, HOUT, WOUT)
    patches = patches.transpose(1, 2, 3, 0, 4, 5).reshape(KDIM, PIX)
    # Row 27 of ones carries the bias through the matmul; pad to (32, 128).
    patches = jnp.concatenate([patches, jnp.ones((1, PIX), jnp.float32)], axis=0)
    patches = jnp.pad(patches, ((0, KDIM_PAD - KDIM_B), (0, PIX_PAD - PIX)))

    # Weights as (COUT, 27) with the bias as column 27 (same ci, kh, kw flattening
    # as patches), padded to (8, 32).
    w_mat = weight.astype(jnp.float32).reshape(COUT, KDIM)
    w_mat = jnp.concatenate([w_mat, bias.astype(jnp.float32)[:, None]], axis=1)
    w_mat = jnp.pad(w_mat, ((0, ROW_PAD - COUT), (0, KDIM_PAD - KDIM_B)))

    out = pl.pallas_call(
        conv_relu_kernel,
        out_shape=jax.ShapeDtypeStruct((ROW_PAD, PIX_PAD), jnp.float32),
        in_specs=[
            pl.BlockSpec(memory_space=pltpu.MemorySpace.VMEM),
            pl.BlockSpec(memory_space=pltpu.MemorySpace.VMEM),
        ],
        out_specs=pl.BlockSpec(memory_space=pltpu.MemorySpace.VMEM),
        compiler_params=pltpu.CompilerParams(
            # Let XLA fuse the (tiny) operand-producing fusions straight into the
            # pallas call instead of materializing them in HBM first.
            allow_input_fusion=[True, True],
        ),
    )(w_mat, patches)

    # Columns are ordered (n, oh, ow); rows are output channels.
    y = out[:COUT, :PIX].reshape(COUT, N, HOUT, WOUT).transpose(1, 0, 2, 3)
    return y


@jax.jit
def reference(x, weight, bias):
    y = jax.lax.conv_general_dilated(
        x, weight,
        window_strides=(STRIDE, STRIDE),
        padding=((PAD, PAD), (PAD, PAD)),
        rhs_dilation=(DIL, DIL),
        dimension_numbers=("NCHW", "OIHW", "NCHW"),
    )
    return jnp.maximum(y + bias[None, :, None, None], 0.0)


if __name__ == "__main__":
    key = jax.random.PRNGKey(0)
    kx, kw, kb = jax.random.split(key, 3)

    # Deterministic "PyTorch-default-style" init: U(-1/sqrt(fan_in), 1/sqrt(fan_in)).
    fan_in = CIN * K * K
    bound = 1.0 / math.sqrt(fan_in)
    weight = jax.random.uniform(kw, (COUT, CIN, K, K), jnp.float32, -bound, bound)
    bias = jax.random.uniform(kb, (COUT,), jnp.float32, -bound, bound)

    x = jax.random.normal(kx, (N, CIN, H, W), jnp.float32)

    out = conv_relu(x, weight, bias)
    out = jax.block_until_ready(out)

    ref = jax.block_until_ready(reference(x, weight, bias))
    assert out.shape == (N, COUT, HOUT, WOUT)
    assert jnp.allclose(out, ref, atol=1e-5, rtol=1e-5), "mismatch vs lax.conv reference"

    print("KERNEL_OK")
</pallas_src>

<mosaic_0001>
module attributes {stable_mosaic.version = 11 : i64} {
  func.func @conv_relu_kernel(%arg0: memref<8x32xf32, #tpu.memory_space<vmem>>, %arg1: memref<32x128xf32, #tpu.memory_space<vmem>>, %arg2: memref<8x128xf32, #tpu.memory_space<vmem>>) attributes {dimension_semantics = [], scalar_prefetch = 0 : i64, scratch_operands = 0 : i64, tpu.core_type = #tpu.core_type<tc>} {
    %c0 = arith.constant 0 : index
    %c0_0 = arith.constant 0 : index
    %0 = vector.load %arg0[%c0, %c0_0] : memref<8x32xf32, #tpu.memory_space<vmem>>, vector<8x32xf32>
    %c0_1 = arith.constant 0 : index
    %c0_2 = arith.constant 0 : index
    %1 = vector.load %arg1[%c0_1, %c0_2] : memref<32x128xf32, #tpu.memory_space<vmem>>, vector<32x128xf32>
    %cst = arith.constant dense<0.000000e+00> : vector<8x128xf32>
    %2 = tpu.matmul %0, %1, %cst {dimension_numbers = #tpu.dot_dimension_numbers<[1], [0], [0], [1], [0, 0, 1, 1], [], []>} : vector<8x32xf32>, vector<32x128xf32>, vector<8x128xf32> -> vector<8x128xf32>
    %cst_3 = arith.constant 0.000000e+00 : f32
    %3 = vector.broadcast %cst_3 : f32 to vector<8x128xf32>
    %4 = arith.maximumf %2, %3 : vector<8x128xf32>
    %c0_4 = arith.constant 0 : index
    %c0_5 = arith.constant 0 : index
    %5 = vector.load %arg2[%c0_4, %c0_5] : memref<8x128xf32, #tpu.memory_space<vmem>>, vector<8x128xf32>
    tpu.vector_store %arg2[%c0_4, %c0_5], %4 {strides = array<i32>} : memref<8x128xf32, #tpu.memory_space<vmem>>, vector<8x128xf32>,
    return
  }
}

</mosaic_0001>

<bundles_post_ra>
// kernel: conv_relu.2
= control target key start
LH: loop header
LB: loop body
LE: loop exit
PB: predicated region body
PF: predicated region fallthrough
CT: control target
= control target key end

     0   :  { %v62_v6 = vlaneseq  ;;  %s485_s0 = inlined_call_operand.vmem [shape: f32[27,98], index: 0, kind: input, shape index: {}]   ;;  %s486_s1 = inlined_call_operand.<no memory space> [shape: f32[], index: 1, kind: input, shape index: {}]   ;;  %s487_s2 = inlined_call_operand.<no memory space> [shape: s32[], index: 2, kind: input, shape index: {}]   ;;  %s488_s3 = inlined_call_operand.<no memory space> [shape: f32[], index: 3, kind: input, shape index: {}]   ;;  %s489_s4 = inlined_call_operand.<no memory space> [shape: s32[], index: 4, kind: input, shape index: {}]   ;;  %s490_s5 = inlined_call_operand.vmem [shape: f32[3,1], index: 5, kind: input, shape index: {}]   ;;  %s491_s6 = inlined_call_operand.<no memory space> [shape: f32[], index: 6, kind: input, shape index: {}]   ;;  %s492_s7 = inlined_call_operand.vmem [shape: f32[3,27], index: 7, kind: input, shape index: {}]   ;;  %s493_s8 = inlined_call_operand.<no memory space> [shape: s32[], index: 8, kind: input, shape index: {}]   ;;  %s494_s9 = inlined_call_operand.vmem [shape: f32[8,128], index: 9, kind: output, shape index: {}]  }
   0x1   :  { %v14_v0 = vstv %s491_s6  ;;  %v16_v1 = vstv %s489_s4  ;;  %v423_v2 = vstv %s488_s3  ;;  %v18_v3 = vstv %s493_s8 }
   0x2   :  { %v19_v4 = vstv %s486_s1  ;;  %v20_v5 = vstv %s487_s2  ;;  %v61_v7 = vld [vmem:[%s490_s5] sm:$0x7]  ;;  %v63_v8 = vshrl.u32 %v62_v6, 7  ;;  %v68_v9 = vand.u32 127, %v62_v6  ;;  %v358_v13 = vld [vmem:[%s485_s0 + $0x18] sm:$0xff]  ;;  %s363_s2 = smov 27  }
   0x3   :  { %v355_v22 = vld [vmem:[%s485_s0 + $0x10] sm:$0xff]  ;;  %v352_v26 = vld [vmem:[%s485_s0 + $0x8] sm:$0xff]  ;;  %v133_v30 = vld [vmem:[%s485_s0] sm:$0xff] }
   0x4   :  { %vm65_vm0 = vcmp.lt.s32.totalorder %v63_v8, 3  ;;  %v69_v10 = vadd.s32 128, %v68_v9  ;;  %vm74_vm1 = vcmp.lt.s32.totalorder %v68_v9, 101  ;;  %vm438_vm2 = vcmp.lt.s32.totalorder %v68_v9, %v20_v5  ;;  %v78_v35 = vld [vmem:[%s492_s7] sm:$0x7] }
   0x5   :  { %v66_v11 = vsel %vm65_vm0, %v61_v7, %v14_v0  ;;  %v267_v14 = vadd.s32 24, %v63_v8  ;;  %vm142_vm4 = vcmp.lt.s32.totalorder %v68_v9, 98  ;;  %v234_v21 = vadd.s32 16, %v63_v8 }
   0x6   :  { %vm70_vm3 = vcmp.lt.s32.totalorder %v69_v10, 129  ;;  %v230_v23 = vsel %vm142_vm4, %v355_v22, %v19_v4  ;;  %v190_v24 = vadd.s32 8, %v63_v8  ;;  %v186_v28 = vsel %vm142_vm4, %v352_v26, %v19_v4 }
   0x7   :  { %v71_v15 = vsel %vm70_vm3, %v66_v11, %v14_v0  ;;  %vm268_vm5 = vcmp.lt.s32.totalorder %v267_v14, 27  ;;  %vm281_vm6 = vcmp.lt.s32.totalorder %v267_v14, %v16_v1  ;;  %vm237_vm8 = vcmp.lt.s32.totalorder %v234_v21, %v16_v1 }
   0x8   :  { %v75_v16 = vsel %vm74_vm1, %v71_v15, %v14_v0  ;;  %v269_v17 = vsel %vm268_vm5, %v358_v13, %v19_v4  ;;  %vm359_vm7 = vmand %vm281_vm6, %vm438_vm2  ;;  %v252_v25 = vsel %vm237_vm8, %v230_v23, %v423_v2  ;;  %vm193_vm10 = vcmp.lt.s32.totalorder %v190_v24, %v16_v1 }
   0x9   :  { %76 = vrot.lane.b32.xlu0 %v75_v16, %s363_s2  ;;  %v274_v18 = vsel %vm142_vm4, %v269_v17, %v19_v4  ;;  %vm356_vm9 = vmand %vm237_vm8, %vm438_vm2  ;;  %v208_v29 = vsel %vm193_vm10, %v186_v28, %v423_v2  ;;  %v143_v32 = vsel %vm142_vm4, %v133_v30, %v19_v4  ;;  %vm150_vm12 = vcmp.lt.s32.totalorder %v63_v8, %v16_v1 }
   0xa   :  { %v296_v19 = vsel %vm281_vm6, %v274_v18, %v423_v2  ;;  %v257_v27 = vsel %vm356_vm9, %v252_v25, %v423_v2  ;;  %vm353_vm11 = vmand %vm193_vm10, %vm438_vm2  ;;  %v165_v33 = vsel %vm150_vm12, %v143_v32, %v423_v2  ;;  %v83_v36 = vsel %vm65_vm0, %v78_v35, %v14_v0 }
   0xb   :  { %v301_v20 = vsel %vm359_vm7, %v296_v19, %v423_v2  ;;  %v213_v31 = vsel %vm353_vm11, %v208_v29, %v423_v2  ;;  %vm350_vm13 = vmand %vm150_vm12, %vm438_vm2  ;;  %vm87_vm14 = vcmp.lt.s32.totalorder %v68_v9, 27  ;;  %vm95_vm15 = vcmp.lt.s32.totalorder %v63_v8, %v18_v3 }
   0xc   :  { %328 = vmatpush.msra.mxu0 %v301_v20  ;;  %v170_v34 = vsel %vm350_vm13, %v165_v33, %v423_v2  ;;  %v88_v37 = vsel %vm87_vm14, %v83_v36, %v14_v0  ;;  %vm104_vm1 = vcmp.lt.s32.totalorder %v68_v9, %v16_v1  ;;  %vm312_vm2 = vcmask 261120  }
   0xd   :  { %vm348_vm3 = vmand %vm95_vm15, %vm104_vm1  ;;  %v110_v38 = vsel %vm95_vm15, %v88_v37, %v423_v2 }
   0xe   :  { %329 = vmatpush.msra.mxu0 %v257_v27  ;;  %v115_v40 = vsel %vm348_vm3, %v110_v38, %v423_v2 }
  0x10   :  { %330 = vmatpush.msra.mxu0 %v213_v31 }
  0x12   :  { %331 = vmatpush.msra.mxu0 %v170_v34 }
  0x7b   :  { %v77_v39 = vpop.permute.xlu0 %76 }
  0x7c   :  { %v119_v41 = vsel %vm95_vm15, %v77_v39, %v423_v2 }
  0x7d   :  { %v124_v42 = vsel %vm348_vm3, %v119_v41, %v423_v2 }
  0x7e   :  { %v128_v43 = vmax.f32 %v115_v40, %v124_v42 }
  0x80   :  { %361 = vmatmul.msk.f32.vlgmr.msra.gmra.mxu0 %vm312_vm2, %v128_v43 }
  0xfd   :  { %v333_v44 = vpop.f32.mrf.mxu0 }
  0xfe   :  { %v336_v45 = vmax.f32 %v333_v44, 0.0 }
 0x100   :  { %337 = vst [vmem:[%s494_s9] sm:$0xff] %v336_v45 }

</bundles_post_ra>
